<compile_context>
chip_gen: v5e
topology: v5e:2x2
jax: 0.10.0
libtpu: 0.0.40
codegen_flags: <defaults>
</compile_context>

<pallas_src>
import functools
import math

import jax
import jax.numpy as jnp
from jax import lax
from jax.experimental import pallas as pl
from jax.experimental.pallas import tpu as pltpu


# ----------------------------------------------------------------------------
# Fused stage kernel: strided Conv1d + depth ResConv1DBlocks (+ optional final
# 3x1 Conv1d for the last stage), all in one pallas_call.
# ----------------------------------------------------------------------------

def _enc_stage_kernel(xr_ref, wd_ref, bd_ref, w3_ref, b3_ref, w1_ref, b1_ref,
                      *rest, stride, pad, cin, t_out, n_batch, dilations,
                      fuse_final):
    if fuse_final:
        wo_ref, bo_ref, o_ref = rest
    else:
        (o_ref,) = rest

    f32, bf16 = jnp.float32, jnp.bfloat16
    s, p = stride, pad

    # xr_ref: (M, s*Cin) with M = N*T_out; row m = (sample n, output step q)
    # holds input times [s*q, s*q + s) channel-minor.
    r = xr_ref[...].astype(f32)
    M = r.shape[0]

    # Within-sample output-row index: doubles as zero-padding mask source and
    # as the sample-boundary mask (circular rolls wrap across samples).
    row = lax.broadcasted_iota(jnp.int32, (M, 1), 0)
    rw = row % t_out

    # Hoisted boundary masks, shared across residual blocks with the same
    # dilation (and with the strided / final convs for d == 1).
    masks = {}
    for d in sorted(set(dilations) | {1}):
        masks[d] = (rw >= d, rw < t_out - d)

    def taps3(h, d):
        """[h(t-d) | h(t) | h(t+d)] along lanes, zero outside the sample."""
        m_lo, m_hi = masks[d]
        h_m = jnp.where(m_lo, pltpu.roll(h, shift=d % M, axis=0), 0.0)
        h_p = jnp.where(m_hi, pltpu.roll(h, shift=(-d) % M, axis=0), 0.0)
        return jnp.concatenate([h_m, h, h_p], axis=-1)                 # (M, 3C)

    # --- strided Conv1d(kernel=2s, stride=s, pad=s//2) as ONE matmul --------
    # Taps 0..p-1 come from output-row q-1, taps p..p+s-1 from row q, the rest
    # from row q+1 (tap-major, channel-minor -- matches the convcol layout).
    m_lo1, m_hi1 = masks[1]
    r_m = jnp.where(m_lo1, pltpu.roll(r, shift=1 % M, axis=0), 0.0)     # row q-1
    r_p = jnp.where(m_hi1, pltpu.roll(r, shift=(-1) % M, axis=0), 0.0)  # row q+1
    xcol = jnp.concatenate(
        [r_m[:, (s - p) * cin:], r, r_p[:, :(s - p) * cin]], axis=-1)   # (M, 2s*Cin)
    x = jnp.dot(xcol.astype(bf16), wd_ref[...],
                preferred_element_type=f32) + bd_ref[...]               # (M, W) f32

    # --- Resnet1D: depth fused ResConv1DBlocks (res_scale folded into w1/b1)
    # TODO(synk): for large depth (>4), switch to a lax.fori_loop over the
    # dilation cycle to bound live ranges / vreg pressure.
    for j, d in enumerate(dilations):
        h = jnp.maximum(x, 0.0)                                         # ReLU (f32)
        hcol = taps3(h, d)                                              # (M, 3W)
        y = jnp.dot(hcol.astype(bf16), w3_ref[j],
                    preferred_element_type=f32) + b3_ref[j]             # (M, Cs)
        y = jnp.maximum(y, 0.0)                                         # ReLU (f32)
        y = jnp.dot(y.astype(bf16), w1_ref[j],
                    preferred_element_type=f32) + b1_ref[j]             # (M, W)
        x = x + y                                                       # residual

    if fuse_final:
        # Final Conv1d(width, out_emb, 3, 1, 1), then store NCT directly
        # ((Cout, T_out) per sample) so the wrapper needs no output transpose.
        xcol = taps3(x, 1)                                              # (M, 3W)
        x = jnp.dot(xcol.astype(bf16), wo_ref[...],
                    preferred_element_type=f32) + bo_ref[...]           # (M, Cout)
        for n in range(n_batch):
            blk = x[n * t_out:(n + 1) * t_out, :]                       # (T_out, Cout)
            o_ref[n] = jnp.transpose(blk, (1, 0)).astype(o_ref.dtype)   # (Cout, T_out)
    else:
        o_ref[...] = x.astype(o_ref.dtype)                              # bf16 stage I/O


def encoder_stage(x_rows, stage_p, *, stride, n_batch, final=None):
    """x_rows: (N*T_in, Cin) channels-last rows (batch-major, time-contiguous).

    Returns (N*T_out, W) bf16 for intermediate stages, or (N, Cout, T_out)
    f32 in NCT layout when `final` (the fused 3x1 output conv) is given.
    """
    M_in, Cin = x_rows.shape
    assert M_in % n_batch == 0
    T_in = M_in // n_batch
    # TODO(synk): odd / unit strides need a different im2col split; Jukebox
    # uses even stride_t (2, 4, ...).
    assert stride >= 2 and stride % 2 == 0, "stride_t must be even"
    assert T_in % stride == 0, "T must be divisible by stride_t"
    T_out = T_in // stride
    M_out = n_batch * T_out

    wd, bd = stage_p["wd"], stage_p["bd"]
    w3, b3 = stage_p["w3"], stage_p["b3"]
    w1, b1 = stage_p["w1"], stage_p["b1"]
    W = wd.shape[-1]
    # Guards the filter_t == 2*stride_t / pad == stride_t//2 im2col assumption.
    assert wd.shape[0] == 2 * stride * Cin, (wd.shape, stride, Cin)

    # Free reshape: row q gathers the s input rows feeding output step q.
    xr = x_rows.reshape(M_out, stride * Cin)

    fuse_final = final is not None
    kernel = functools.partial(
        _enc_stage_kernel, stride=stride, pad=stride // 2, cin=Cin,
        t_out=T_out, n_batch=n_batch, dilations=tuple(stage_p["dilations"]),
        fuse_final=fuse_final)

    args = [xr, wd, bd, w3, b3, w1, b1]
    if fuse_final:
        args += [final["w"], final["b"]]
        Cout = final["w"].shape[-1]
        out_shape = jax.ShapeDtypeStruct((n_batch, Cout, T_out), jnp.float32)
    else:
        out_shape = jax.ShapeDtypeStruct((M_out, W), jnp.bfloat16)

    vmem = pl.BlockSpec(memory_space=pltpu.MemorySpace.VMEM)
    return pl.pallas_call(
        kernel,
        out_shape=out_shape,
        in_specs=[vmem] * len(args),
        out_specs=vmem,
        compiler_params=pltpu.CompilerParams(
            vmem_limit_bytes=32 * 1024 * 1024),
    )(*args)


# ----------------------------------------------------------------------------
# Parameter init (PyTorch-layout) + one-time kernel-layout preparation
# ----------------------------------------------------------------------------

def _init_conv1d(key, cin, cout, k):
    kw, kb = jax.random.split(key)
    bound = 1.0 / math.sqrt(cin * k)
    w = jax.random.uniform(kw, (cout, cin, k), jnp.float32, -bound, bound)
    b = jax.random.uniform(kb, (cout,), jnp.float32, -bound, bound)
    return w, b


def init_encoder_params(key, cfg):
    keys = iter(jax.random.split(key, 256))
    width = cfg["width"]
    n_state = int(cfg["m_conv"] * width)
    filter_t = cfg["stride_t"] * 2
    stages = []
    for i in range(cfg["down_t"]):
        cin = cfg["input_emb_width"] if i == 0 else width
        wd, bd = _init_conv1d(next(keys), cin, width, filter_t)
        res = []
        for depth_idx in range(cfg["depth"]):
            dd = (depth_idx if cfg["dilation_cycle"] is None
                  else depth_idx % cfg["dilation_cycle"])
            dil = cfg["dilation_growth_rate"] ** dd
            w3, b3 = _init_conv1d(next(keys), width, n_state, 3)
            w1, b1 = _init_conv1d(next(keys), n_state, width, 1)
            res.append(dict(w3=w3, b3=b3, w1=w1, b1=b1, dilation=dil))
        stages.append(dict(wd=wd, bd=bd, res=res))
    wout, bout = _init_conv1d(next(keys), width, cfg["output_emb_width"], 3)
    return dict(stages=stages, out=(wout, bout))


def prepare_params(raw, cfg):
    """One-time conversion: PyTorch layout -> kernel layout (tap-major im2col
    columns), bf16 MXU weights, res_scale folded into the 1x1 conv."""
    res_scale_val = (1.0 if not cfg["res_scale"]
                     else 1.0 / math.sqrt(cfg["depth"]))

    def convcol(w):          # (Cout, Cin, K) -> (K*Cin, Cout), tap-major, bf16
        cout, cin, k = w.shape
        return (jnp.transpose(w, (2, 1, 0)).reshape(k * cin, cout)
                .astype(jnp.bfloat16))

    stages = []
    for st in raw["stages"]:
        w3 = jnp.stack([convcol(rb["w3"]) for rb in st["res"]])       # (D, 3W, Cs) bf16
        b3 = jnp.stack([rb["b3"][None, :] for rb in st["res"]])       # (D, 1, Cs) f32
        w1 = jnp.stack([(res_scale_val
                         * jnp.transpose(rb["w1"][:, :, 0], (1, 0))
                         ).astype(jnp.bfloat16) for rb in st["res"]]) # (D, Cs, W) bf16
        b1 = jnp.stack([res_scale_val * rb["b1"][None, :]
                        for rb in st["res"]])                         # (D, 1, W) f32
        dil = tuple(int(rb["dilation"]) for rb in st["res"])
        stages.append(dict(wd=convcol(st["wd"]), bd=st["bd"][None, :],
                           w3=w3, b3=b3, w1=w1, b1=b1, dilations=dil))
    wout, bout = raw["out"]
    return dict(stages=stages, out=dict(w=convcol(wout), b=bout[None, :]))


# ----------------------------------------------------------------------------
# Forward (Pallas) and pure-JAX reference
# ----------------------------------------------------------------------------

def encoder_conv_block_forward(x_nct, params, cfg):
    assert len(params["stages"]) >= 1
    N, _, T = x_nct.shape
    # NCT -> channels-last rows (N*T, C): batch folded into the matmul M axis.
    x = jnp.transpose(x_nct, (0, 2, 1)).reshape(N * T, -1)
    n_stage = len(params["stages"])
    for i, st in enumerate(params["stages"]):
        final = params["out"] if i == n_stage - 1 else None
        x = encoder_stage(x, st, stride=cfg["stride_t"], n_batch=N, final=final)
    return x    # last stage already stored NCT: (N, output_emb_width, T_out)


def _conv1d_ref(x_nct, w, b, *, stride=1, pad=0, dilation=1):
    y = lax.conv_general_dilated(
        x_nct, w, window_strides=(stride,), padding=[(pad, pad)],
        rhs_dilation=(dilation,), dimension_numbers=("NCH", "OIH", "NCH"),
        precision=lax.Precision.HIGHEST)
    return y + b[None, :, None]


def encoder_conv_block_ref(x_nct, raw, cfg):
    res_scale_val = (1.0 if not cfg["res_scale"]
                     else 1.0 / math.sqrt(cfg["depth"]))
    s = cfg["stride_t"]
    pad_t = s // 2
    x = x_nct
    for st in raw["stages"]:
        x = _conv1d_ref(x, st["wd"], st["bd"], stride=s, pad=pad_t)
        for rb in st["res"]:
            h = jax.nn.relu(x)
            h = _conv1d_ref(h, rb["w3"], rb["b3"],
                            pad=rb["dilation"], dilation=rb["dilation"])
            h = jax.nn.relu(h)
            h = _conv1d_ref(h, rb["w1"], rb["b1"])
            x = x + res_scale_val * h
    wout, bout = raw["out"]
    return _conv1d_ref(x, wout, bout, pad=1)


# ----------------------------------------------------------------------------

if __name__ == "__main__":
    cfg = dict(
        input_emb_width=8,
        output_emb_width=32,
        down_t=2,
        stride_t=2,
        width=32,
        depth=2,
        m_conv=1.0,
        dilation_growth_rate=3,
        dilation_cycle=None,
        res_scale=True,
    )
    N, T = 2, 32
    key = jax.random.PRNGKey(0)
    kx, kp = jax.random.split(key)
    x = jax.random.normal(kx, (N, cfg["input_emb_width"], T), jnp.float32)

    raw = init_encoder_params(kp, cfg)
    params = prepare_params(raw, cfg)

    out = encoder_conv_block_forward(x, params, cfg)
    out = jax.block_until_ready(out)

    T_out = T // (cfg["stride_t"] ** cfg["down_t"])
    assert out.shape == (N, cfg["output_emb_width"], T_out), out.shape

    ref = encoder_conv_block_ref(x, raw, cfg)
    rel_err = float(jnp.max(jnp.abs(out - ref)) / (jnp.max(jnp.abs(ref)) + 1e-8))
    # bf16 MXU operands + bf16 inter-stage HBM I/O vs an all-f32 XLA reference.
    assert rel_err < 5e-2, f"mismatch vs reference: rel_err={rel_err}"

    print("KERNEL_OK")
</pallas_src>

<mosaic_0001>
module attributes {stable_mosaic.version = 11 : i64} {
  func.func @_enc_stage_kernel(%arg0: memref<32x16xf32, #tpu.memory_space<vmem>>, %arg1: memref<32x32xbf16, #tpu.memory_space<vmem>>, %arg2: memref<1x32xf32, #tpu.memory_space<vmem>>, %arg3: memref<2x96x32xbf16, #tpu.memory_space<vmem>>, %arg4: memref<2x1x32xf32, #tpu.memory_space<vmem>>, %arg5: memref<2x32x32xbf16, #tpu.memory_space<vmem>>, %arg6: memref<2x1x32xf32, #tpu.memory_space<vmem>>, %arg7: memref<32x32xbf16, #tpu.memory_space<vmem>>) attributes {dimension_semantics = [], scalar_prefetch = 0 : i64, scratch_operands = 0 : i64, tpu.core_type = #tpu.core_type<tc>} {
    %c0 = arith.constant 0 : index
    %c0_0 = arith.constant 0 : index
    %0 = vector.load %arg0[%c0, %c0_0] : memref<32x16xf32, #tpu.memory_space<vmem>>, vector<32x16xf32>
    %1 = tpu.iota {dimensions = array<i32: 0>} : vector<32x1xi32>
    %c16_i32 = arith.constant 16 : i32
    %c0_i32 = arith.constant 0 : i32
    %2 = arith.cmpi eq, %c16_i32, %c0_i32 : i32
    %c1_i32 = arith.constant 1 : i32
    %3 = arith.select %2, %c1_i32, %c16_i32 : i32
    %4 = vector.broadcast %3 : i32 to vector<32x1xi32>
    %5 = arith.remsi %1, %4 : vector<32x1xi32>
    %c0_i32_1 = arith.constant 0 : i32
    %6 = vector.broadcast %c0_i32_1 : i32 to vector<32x1xi32>
    %7 = arith.cmpi ne, %5, %6 : vector<32x1xi32>
    %c0_i32_2 = arith.constant 0 : i32
    %8 = vector.broadcast %c0_i32_2 : i32 to vector<32x1xi32>
    %9 = arith.cmpi slt, %5, %8 : vector<32x1xi32>
    %c0_i32_3 = arith.constant 0 : i32
    %10 = arith.cmpi slt, %3, %c0_i32_3 : i32
    %11 = vector.broadcast %10 : i1 to vector<32x1xi1>
    %12 = vector.broadcast %11 : vector<32x1xi1> to vector<32x1xi1>
    %13 = arith.xori %9, %12 : vector<32x1xi1>
    %14 = arith.andi %13, %7 : vector<32x1xi1>
    %15 = vector.broadcast %3 : i32 to vector<32x1xi32>
    %16 = arith.addi %5, %15 : vector<32x1xi32>
    %17 = arith.select %14, %16, %5 : vector<32x1xi1>, vector<32x1xi32>
    %c1_i32_4 = arith.constant 1 : i32
    %18 = vector.broadcast %c1_i32_4 : i32 to vector<32x1xi32>
    %19 = arith.cmpi sge, %17, %18 : vector<32x1xi32>
    %c15_i32 = arith.constant 15 : i32
    %20 = vector.broadcast %c15_i32 : i32 to vector<32x1xi32>
    %21 = arith.cmpi slt, %17, %20 : vector<32x1xi32>
    %c3_i32 = arith.constant 3 : i32
    %22 = vector.broadcast %c3_i32 : i32 to vector<32x1xi32>
    %23 = arith.cmpi sge, %17, %22 : vector<32x1xi32>
    %c13_i32 = arith.constant 13 : i32
    %24 = vector.broadcast %c13_i32 : i32 to vector<32x1xi32>
    %25 = arith.cmpi slt, %17, %24 : vector<32x1xi32>
    %c1_i32_5 = arith.constant 1 : i32
    %26 = tpu.dynamic_rotate %0 by %c1_i32_5 dim 0 : vector<32x16xf32>, i32 -> vector<32x16xf32>
    %cst = arith.constant 0.000000e+00 : f32
    %27 = vector.shape_cast %19 : vector<32x1xi1> to vector<32x1xi1>
    %28 = vector.broadcast %27 : vector<32x1xi1> to vector<32x16xi1>
    %29 = vector.broadcast %cst : f32 to vector<32x16xf32>
    %30 = arith.select %28, %26, %29 : vector<32x16xi1>, vector<32x16xf32>
    %c31_i32 = arith.constant 31 : i32
    %31 = tpu.dynamic_rotate %0 by %c31_i32 dim 0 : vector<32x16xf32>, i32 -> vector<32x16xf32>
    %cst_6 = arith.constant 0.000000e+00 : f32
    %32 = vector.shape_cast %21 : vector<32x1xi1> to vector<32x1xi1>
    %33 = vector.broadcast %32 : vector<32x1xi1> to vector<32x16xi1>
    %34 = vector.broadcast %cst_6 : f32 to vector<32x16xf32>
    %35 = arith.select %33, %31, %34 : vector<32x16xi1>, vector<32x16xf32>
    %36 = vector.extract_strided_slice %30 {offsets = [0, 8], sizes = [32, 8], strides = [1, 1]} : vector<32x16xf32> to vector<32x8xf32>
    %37 = vector.extract_strided_slice %35 {offsets = [0, 0], sizes = [32, 8], strides = [1, 1]} : vector<32x16xf32> to vector<32x8xf32>
    %38 = tpu.concatenate %36, %0, %37 in 1 : vector<32x8xf32>, vector<32x16xf32>, vector<32x8xf32> -> vector<32x32xf32>
    %39 = arith.truncf %38 : vector<32x32xf32> to vector<32x32xbf16>
    %c0_7 = arith.constant 0 : index
    %c0_8 = arith.constant 0 : index
    %40 = vector.load %arg1[%c0_7, %c0_8] : memref<32x32xbf16, #tpu.memory_space<vmem>>, vector<32x32xbf16>
    %cst_9 = arith.constant dense<0.000000e+00> : vector<32x32xf32>
    %41 = tpu.matmul %39, %40, %cst_9 {dimension_numbers = #tpu.dot_dimension_numbers<[1], [0], [0], [1], [0, 0, 1, 1], [], []>} : vector<32x32xbf16>, vector<32x32xbf16>, vector<32x32xf32> -> vector<32x32xf32>
    %c0_10 = arith.constant 0 : index
    %c0_11 = arith.constant 0 : index
    %42 = vector.load %arg2[%c0_10, %c0_11] : memref<1x32xf32, #tpu.memory_space<vmem>>, vector<1x32xf32>
    %43 = vector.broadcast %42 : vector<1x32xf32> to vector<32x32xf32>
    %44 = arith.addf %41, %43 : vector<32x32xf32>
    %cst_12 = arith.constant 0.000000e+00 : f32
    %45 = vector.broadcast %cst_12 : f32 to vector<32x32xf32>
    %46 = arith.maximumf %44, %45 : vector<32x32xf32>
    %c1_i32_13 = arith.constant 1 : i32
    %47 = tpu.dynamic_rotate %46 by %c1_i32_13 dim 0 : vector<32x32xf32>, i32 -> vector<32x32xf32>
    %cst_14 = arith.constant 0.000000e+00 : f32
    %48 = vector.shape_cast %19 : vector<32x1xi1> to vector<32x1xi1>
    %49 = vector.broadcast %48 : vector<32x1xi1> to vector<32x32xi1>
    %50 = vector.broadcast %cst_14 : f32 to vector<32x32xf32>
    %51 = arith.select %49, %47, %50 : vector<32x32xi1>, vector<32x32xf32>
    %c31_i32_15 = arith.constant 31 : i32
    %52 = tpu.dynamic_rotate %46 by %c31_i32_15 dim 0 : vector<32x32xf32>, i32 -> vector<32x32xf32>
    %cst_16 = arith.constant 0.000000e+00 : f32
    %53 = vector.shape_cast %21 : vector<32x1xi1> to vector<32x1xi1>
    %54 = vector.broadcast %53 : vector<32x1xi1> to vector<32x32xi1>
    %55 = vector.broadcast %cst_16 : f32 to vector<32x32xf32>
    %56 = arith.select %54, %52, %55 : vector<32x32xi1>, vector<32x32xf32>
    %57 = tpu.concatenate %51, %46, %56 in 1 : vector<32x32xf32>, vector<32x32xf32>, vector<32x32xf32> -> vector<32x96xf32>
    %58 = arith.truncf %57 : vector<32x96xf32> to vector<32x96xbf16>
    %c0_17 = arith.constant 0 : index
    %c0_18 = arith.constant 0 : index
    %c0_19 = arith.constant 0 : index
    %59 = vector.load %arg3[%c0_17, %c0_18, %c0_19] : memref<2x96x32xbf16, #tpu.memory_space<vmem>>, vector<1x96x32xbf16>
    %60 = vector.shape_cast %59 : vector<1x96x32xbf16> to vector<96x32xbf16>
    %cst_20 = arith.constant dense<0.000000e+00> : vector<32x32xf32>
    %61 = tpu.matmul %58, %60, %cst_20 {dimension_numbers = #tpu.dot_dimension_numbers<[1], [0], [0], [1], [0, 0, 1, 1], [], []>} : vector<32x96xbf16>, vector<96x32xbf16>, vector<32x32xf32> -> vector<32x32xf32>
    %c0_21 = arith.constant 0 : index
    %c0_22 = arith.constant 0 : index
    %c0_23 = arith.constant 0 : index
    %62 = vector.load %arg4[%c0_21, %c0_22, %c0_23] : memref<2x1x32xf32, #tpu.memory_space<vmem>>, vector<1x1x32xf32>
    %63 = vector.shape_cast %62 : vector<1x1x32xf32> to vector<1x32xf32>
    %64 = vector.broadcast %63 : vector<1x32xf32> to vector<32x32xf32>
    %65 = arith.addf %61, %64 : vector<32x32xf32>
    %cst_24 = arith.constant 0.000000e+00 : f32
    %66 = vector.broadcast %cst_24 : f32 to vector<32x32xf32>
    %67 = arith.maximumf %65, %66 : vector<32x32xf32>
    %68 = arith.truncf %67 : vector<32x32xf32> to vector<32x32xbf16>
    %c0_25 = arith.constant 0 : index
    %c0_26 = arith.constant 0 : index
    %c0_27 = arith.constant 0 : index
    %69 = vector.load %arg5[%c0_25, %c0_26, %c0_27] : memref<2x32x32xbf16, #tpu.memory_space<vmem>>, vector<1x32x32xbf16>
    %70 = vector.shape_cast %69 : vector<1x32x32xbf16> to vector<32x32xbf16>
    %cst_28 = arith.constant dense<0.000000e+00> : vector<32x32xf32>
    %71 = tpu.matmul %68, %70, %cst_28 {dimension_numbers = #tpu.dot_dimension_numbers<[1], [0], [0], [1], [0, 0, 1, 1], [], []>} : vector<32x32xbf16>, vector<32x32xbf16>, vector<32x32xf32> -> vector<32x32xf32>
    %c0_29 = arith.constant 0 : index
    %c0_30 = arith.constant 0 : index
    %c0_31 = arith.constant 0 : index
    %72 = vector.load %arg6[%c0_29, %c0_30, %c0_31] : memref<2x1x32xf32, #tpu.memory_space<vmem>>, vector<1x1x32xf32>
    %73 = vector.shape_cast %72 : vector<1x1x32xf32> to vector<1x32xf32>
    %74 = vector.broadcast %73 : vector<1x32xf32> to vector<32x32xf32>
    %75 = arith.addf %71, %74 : vector<32x32xf32>
    %76 = arith.addf %44, %75 : vector<32x32xf32>
    %cst_32 = arith.constant 0.000000e+00 : f32
    %77 = vector.broadcast %cst_32 : f32 to vector<32x32xf32>
    %78 = arith.maximumf %76, %77 : vector<32x32xf32>
    %c3_i32_33 = arith.constant 3 : i32
    %79 = tpu.dynamic_rotate %78 by %c3_i32_33 dim 0 : vector<32x32xf32>, i32 -> vector<32x32xf32>
    %cst_34 = arith.constant 0.000000e+00 : f32
    %80 = vector.shape_cast %23 : vector<32x1xi1> to vector<32x1xi1>
    %81 = vector.broadcast %80 : vector<32x1xi1> to vector<32x32xi1>
    %82 = vector.broadcast %cst_34 : f32 to vector<32x32xf32>
    %83 = arith.select %81, %79, %82 : vector<32x32xi1>, vector<32x32xf32>
    %c29_i32 = arith.constant 29 : i32
    %84 = tpu.dynamic_rotate %78 by %c29_i32 dim 0 : vector<32x32xf32>, i32 -> vector<32x32xf32>
    %cst_35 = arith.constant 0.000000e+00 : f32
    %85 = vector.shape_cast %25 : vector<32x1xi1> to vector<32x1xi1>
    %86 = vector.broadcast %85 : vector<32x1xi1> to vector<32x32xi1>
    %87 = vector.broadcast %cst_35 : f32 to vector<32x32xf32>
    %88 = arith.select %86, %84, %87 : vector<32x32xi1>, vector<32x32xf32>
    %89 = tpu.concatenate %83, %78, %88 in 1 : vector<32x32xf32>, vector<32x32xf32>, vector<32x32xf32> -> vector<32x96xf32>
    %90 = arith.truncf %89 : vector<32x96xf32> to vector<32x96xbf16>
    %c1 = arith.constant 1 : index
    %c0_36 = arith.constant 0 : index
    %c0_37 = arith.constant 0 : index
    %91 = vector.load %arg3[%c1, %c0_36, %c0_37] : memref<2x96x32xbf16, #tpu.memory_space<vmem>>, vector<1x96x32xbf16>
    %92 = vector.shape_cast %91 : vector<1x96x32xbf16> to vector<96x32xbf16>
    %cst_38 = arith.constant dense<0.000000e+00> : vector<32x32xf32>
    %93 = tpu.matmul %90, %92, %cst_38 {dimension_numbers = #tpu.dot_dimension_numbers<[1], [0], [0], [1], [0, 0, 1, 1], [], []>} : vector<32x96xbf16>, vector<96x32xbf16>, vector<32x32xf32> -> vector<32x32xf32>
    %c1_39 = arith.constant 1 : index
    %c0_40 = arith.constant 0 : index
    %c0_41 = arith.constant 0 : index
    %94 = vector.load %arg4[%c1_39, %c0_40, %c0_41] : memref<2x1x32xf32, #tpu.memory_space<vmem>>, vector<1x1x32xf32>
    %95 = vector.shape_cast %94 : vector<1x1x32xf32> to vector<1x32xf32>
    %96 = vector.broadcast %95 : vector<1x32xf32> to vector<32x32xf32>
    %97 = arith.addf %93, %96 : vector<32x32xf32>
    %cst_42 = arith.constant 0.000000e+00 : f32
    %98 = vector.broadcast %cst_42 : f32 to vector<32x32xf32>
    %99 = arith.maximumf %97, %98 : vector<32x32xf32>
    %100 = arith.truncf %99 : vector<32x32xf32> to vector<32x32xbf16>
    %c1_43 = arith.constant 1 : index
    %c0_44 = arith.constant 0 : index
    %c0_45 = arith.constant 0 : index
    %101 = vector.load %arg5[%c1_43, %c0_44, %c0_45] : memref<2x32x32xbf16, #tpu.memory_space<vmem>>, vector<1x32x32xbf16>
    %102 = vector.shape_cast %101 : vector<1x32x32xbf16> to vector<32x32xbf16>
    %cst_46 = arith.constant dense<0.000000e+00> : vector<32x32xf32>
    %103 = tpu.matmul %100, %102, %cst_46 {dimension_numbers = #tpu.dot_dimension_numbers<[1], [0], [0], [1], [0, 0, 1, 1], [], []>} : vector<32x32xbf16>, vector<32x32xbf16>, vector<32x32xf32> -> vector<32x32xf32>
    %c1_47 = arith.constant 1 : index
    %c0_48 = arith.constant 0 : index
    %c0_49 = arith.constant 0 : index
    %104 = vector.load %arg6[%c1_47, %c0_48, %c0_49] : memref<2x1x32xf32, #tpu.memory_space<vmem>>, vector<1x1x32xf32>
    %105 = vector.shape_cast %104 : vector<1x1x32xf32> to vector<1x32xf32>
    %106 = vector.broadcast %105 : vector<1x32xf32> to vector<32x32xf32>
    %107 = arith.addf %103, %106 : vector<32x32xf32>
    %108 = arith.addf %76, %107 : vector<32x32xf32>
    %109 = arith.truncf %108 : vector<32x32xf32> to vector<32x32xbf16>
    %c0_50 = arith.constant 0 : index
    %c0_51 = arith.constant 0 : index
    %110 = vector.load %arg7[%c0_50, %c0_51] : memref<32x32xbf16, #tpu.memory_space<vmem>>, vector<32x32xbf16>
    tpu.vector_store %arg7[%c0_50, %c0_51], %109 {strides = array<i32>} : memref<32x32xbf16, #tpu.memory_space<vmem>>, vector<32x32xbf16>,
    return
  }
}

</mosaic_0001>

<bundles_post_ra>
// kernel: tpu_custom_call.1
= control target key start
LH: loop header
LB: loop body
LE: loop exit
PB: predicated region body
PF: predicated region fallthrough
CT: control target
= control target key end

     0   :  { %v32_v3 = vlaneseq  ;;  %s1266_s0 = inlined_call_operand.vmem [shape: f32[32,16], index: 0, kind: input, shape index: {}]   ;;  %s1267_s1 = inlined_call_operand.vmem [shape: bf16[32,32], index: 1, kind: input, shape index: {}]   ;;  %s1268_s2 = inlined_call_operand.vmem [shape: f32[1,32], index: 2, kind: input, shape index: {}]   ;;  %s1269_s3 = inlined_call_operand.vmem [shape: bf16[2,96,32], index: 3, kind: input, shape index: {}]   ;;  %s1270_s4 = inlined_call_operand.vmem [shape: f32[2,1,32], index: 4, kind: input, shape index: {}]   ;;  %s1271_s5 = inlined_call_operand.vmem [shape: bf16[2,32,32], index: 5, kind: input, shape index: {}]   ;;  %s1272_s6 = inlined_call_operand.vmem [shape: f32[2,1,32], index: 6, kind: input, shape index: {}]   ;;  %s1273_s7 = inlined_call_operand.hbm [shape: bf16[32,32], index: 7, kind: output, shape index: {}]  }
   0x1   :  { %v28_v0 = vld [vmem:[%s1266_s0] sm:$0xff]  ;;  %v29_v1 = vld [vmem:[%s1266_s0 + $0x8] sm:$0xff]  ;;  %v31_v2 = vld [vmem:[%s1266_s0 + $0x18] sm:$0xff] }
   0x2   :  { %v101_v4 = vrot.slane %v28_v0, 7  ;;  %v102_v5 = vrot.slane %v29_v1, 7  ;;  %v104_v6 = vrot.slane %v31_v2, 7  ;;  %v30_v7 = vld [vmem:[%s1266_s0 + $0x10] sm:$0xff]  ;;  %v991_v8 = vshrl.u32 %v32_v3, 7  ;;  %s932_s0 = smov 8  }
   0x3   :  { %v123_v9 = vrot.slane %v29_v1, 1  ;;  %v124_v10 = vrot.slane %v30_v7, 1  ;;  %v122_v11 = vrot.slane %v28_v0, 1  ;;  %v851_v12 = vpack.i.bf16 %v31_v2, %v30_v7 }
   0x4   :  { %v41_v13 = vand.u32 15, %v991_v8  ;;  %vm105_vm0 = vcmp.lt.s32.totalorder %v991_v8, 1  ;;  %v996_v14 = vadd.s32 8, %v991_v8  ;;  %vm126_vm1 = vcmp.lt.s32.totalorder %v991_v8, 7 }
   0x5   :  { %v108_v15 = vsel %vm105_vm0, %v101_v4, %v102_v5  ;;  %v109_v16 = vsel %vm105_vm0, %v104_v6, %v101_v4  ;;  %v103_v17 = vrot.slane %v30_v7, 7  ;;  %852 = vrot.lane.b32.xlu2 %v851_v12, %s932_s0  ;;  %v125_v18 = vrot.slane %v31_v2, 1 }
   0x6   :  { %12 = vsyncpa [#allocation3], 0  ;;  %vm1006_vm2 = vcmp.ge.s32.totalorder %v41_v13, 1  ;;  %v48_v20 = vand.u32 15, %v996_v14  ;;  %v128_v21 = vsel %vm126_vm1, %v123_v9, %v124_v10  ;;  %v1014_v22 = vadd.s32 16, %v991_v8  ;;  %s933_s9 = smov 120  }
   0x7   :  { %v118_v23 = vsel %vm1006_vm2, %v109_v16, 0.0  ;;  %v129_v24 = vsel %vm126_vm1, %v122_v11, %v123_v9  ;;  %v1021_v25 = vadd.s32 24, %v991_v8  ;;  %v130_v31 = vsel %vm126_vm1, %v125_v18, %v122_v11  ;;  %s934_s10 = smov 24   ;;  %v805_v43 = vld [vmem:[%s1267_s1 + $0x8] sm:$0xff]  ;;  %v804_v44 = vld [vmem:[%s1267_s1] sm:$0xff]  ;;  %s936_s16 = smov 64  }
   0x8   :  { %v831_v26 = vpack.i.bf16 %v108_v15, %v118_v23  ;;  %vm1025_vm3 = vcmp.lt.s32.totalorder %v48_v20, 15  ;;  %v55_v28 = vand.u32 15, %v1014_v22  ;;  %v107_v34 = vsel %vm105_vm0, %v102_v5, %v103_v17  ;;  %236 = vmatpush.bf16.msra.mxu0 %v805_v43  ;;  %822 = vmatpush.bf16.msra.mxu2 %v805_v43  ;;  %v808_v36 = vld [vmem:[%s1269_s3 + $0x10] sm:$0xff]  ;;  %v821_v22 = vld [vmem:[%s1271_s5 + $0x18] sm:$0xff] }
   0x9   :  { %v140_v29 = vsel %vm1025_vm3, %v128_v21, 0.0  ;;  %v62_v30 = vand.u32 15, %v1021_v25  ;;  %v127_v35 = vsel %vm126_vm1, %v124_v10, %v125_v18  ;;  %v106_v38 = vsel %vm105_vm0, %v103_v17, %v104_v6  ;;  %v901_v10 = vld [vmem:[%s1268_s2] ss:$0 sm:$0xff]  ;;  %s935_s2 = smov 32  }
   0xa   :  { %832 = vrot.lane.b32.xlu0 %v831_v26, %s933_s9  ;;  %v841_v32 = vpack.i.bf16 %v140_v29, %v129_v24  ;;  %vm1037_vm4 = vcmp.ge.s32.totalorder %v55_v28, 1  ;;  %v836_v41 = vpack.i.bf16 %v29_v1, %v28_v0  ;;  %vm191_vm6 = vcmask 64512  }
   0xb   :  { %vm1047_vm5 = vcmp.lt.s32.totalorder %v62_v30, 15  ;;  %v120_v39 = vsel %vm1037_vm4, %v107_v34, 0.0  ;;  %vm196_vm7 = vcmask 195584   ;;  %vm223_vm8 = vcmask 261120  }
   0xc   :  { %842 = vrot.lane.b32.xlu1 %v841_v32, %s934_s10  ;;  %v142_v37 = vsel %vm1047_vm5, %v130_v31, 0.0  ;;  %v846_v42 = vpack.i.bf16 %v106_v38, %v120_v39  ;;  %237 = vmatpush.bf16.msra.mxu0 %v804_v44  ;;  %vm313_vm9 = vcmask 523264   ;;  %vm372_vm10 = vcmask 785408  }
   0xd   :  { %v856_v40 = vpack.i.bf16 %v142_v37, %v127_v35  ;;  %823 = vmatpush.bf16.msra.mxu2 %v804_v44  ;;  %vm461_vm11 = vcmp.lt.s32.totalorder %v991_v8, 3  ;;  %vm98_vm12 = vcmp.lt.s32.totalorder %v48_v20, 13  ;;  %vm482_vm13 = vcmp.lt.s32.totalorder %v991_v8, 5  ;;  %v815_v8 = vld [vmem:[%s1269_s3 + $0x38] sm:$0xff] }
   0xe   :  { %vm1197_vm14 = vcmp.ge.s32.totalorder %v41_v13, 3  ;;  %vm100_vm15 = vcmp.lt.s32.totalorder %v62_v30, 13  ;;  %v817_v30 = vld [vmem:[%s1269_s3 + $0x48] sm:$0xff] }
   0xf   :  { %857 = vrot.lane.b32.xlu2 %v856_v40, %s934_s10 }
  0x10   :  { %660 = vmatpush.bf16.msrb.mxu0 %v821_v22 }
  0x12   :  { %837 = vrot.lane.b32.xlu0 %v836_v41, %s932_s0  ;;  %s692_s0 = sshll.u32 %s1273_s7, 4  ;;  %s693_s0 = int_to_ptr.hbm [resolvable:$true] %s692_s0 }
  0x14   :  { %847 = vrot.lane.b32.xlu1 %v846_v42, %s933_s9  ;;  %s938_s9 = smov 4  }
  0x5f   :  { %v853_v45 = vpop.permute.xlu2 %852 }
  0x60   :  { %v855_v49 = vunpack.i.h.bf16 %v853_v45  ;;  %v854_v50 = vunpack.i.l.bf16 %v853_v45 }
  0x69   :  { %v858_v48 = vpop.permute.xlu2 %857 }
  0x6a   :  { %v860_v59 = vunpack.i.h.bf16 %v858_v48  ;;  %v859_v60 = vunpack.i.l.bf16 %v858_v48 }
  0x7c   :  { %v833_v46 = vpop.permute.xlu0 %832 }
  0x7d   :  { %v835_v52 = vunpack.i.h.bf16 %v833_v46  ;;  %v834_v53 = vunpack.i.l.bf16 %v833_v46 }
  0x7e   :  { %v843_v47 = vpop.permute.xlu1 %842 }
  0x7f   :  { %v845_v56 = vunpack.i.h.bf16 %v843_v47  ;;  %v844_v57 = vunpack.i.l.bf16 %v843_v47 }
  0x84   :  { %v838_v51 = vpop.permute.xlu0 %837 }
  0x85   :  { %v840_v54 = vunpack.i.h.bf16 %v838_v51  ;;  %v839_v55 = vunpack.i.l.bf16 %v838_v51 }
  0x86   :  { %v848_v58 = vpop.permute.xlu1 %847 }
  0x87   :  { %v192_v61 = vsel %vm191_vm6, %v834_v53, %v839_v55  ;;  %v193_v62 = vsel %vm191_vm6, %v835_v52, %v840_v54  ;;  %v850_v63 = vunpack.i.h.bf16 %v848_v58  ;;  %v849_v0 = vunpack.i.l.bf16 %v848_v58  ;;  %v811_v55 = vld [vmem:[%s1269_s3 + $0x28] sm:$0xff] }
  0x88   :  { %v197_v1 = vsel %vm196_vm7, %v192_v61, %v844_v57  ;;  %v198_v2 = vsel %vm196_vm7, %v193_v62, %v845_v56  ;;  %381 = vmatpush.bf16.msra.mxu1 %v811_v55  ;;  %v810_v56 = vld [vmem:[%s1269_s3 + $0x20] sm:$0xff]  ;;  %v809_v57 = vld [vmem:[%s1269_s3 + $0x18] sm:$0xff]  ;;  %v807_v58 = vld [vmem:[%s1269_s3 + $0x8] sm:$0xff] }
  0x89   :  { %v195_v3 = vsel %vm191_vm6, %v850_v63, %v855_v49  ;;  %v194_v4 = vsel %vm191_vm6, %v849_v0, %v854_v50  ;;  %v201_v5 = vpack.c.bf16 %v198_v2, %v197_v1  ;;  %v818_v55 = vld [vmem:[%s1269_s3 + $0x50] sm:$0xff] }
  0x8a   :  { %v199_v6 = vsel %vm196_vm7, %v194_v4, %v859_v60  ;;  %v200_v7 = vsel %vm196_vm7, %v195_v3, %v860_v59  ;;  %v806_v59 = vld [vmem:[%s1269_s3] sm:$0xff]  ;;  %v813_v60 = vld [vmem:[%s1271_s5 + $0x8] sm:$0xff] }
  0x8b   :  { %712 = vmatmul.msk.bf16.vlgmr.msra.gmra.mxu0 %vm223_vm8, %v201_v5  ;;  %v202_v9 = vpack.c.bf16 %v200_v7, %v199_v6  ;;  %436 = vmatpush.bf16.msrb.mxu2 %v813_v60 }
  0x8c   :  { %382 = vmatpush.bf16.msra.mxu1 %v810_v56 }
  0x8d   :  { %713 = vmatmul.msk.bf16.vlgmr.msra.gmra.mxu2 %vm223_vm8, %v202_v9 }
  0x90   :  { %383 = vmatpush.bf16.msra.mxu1 %v809_v57 }
  0x94   :  { %384 = vmatpush.bf16.msra.mxu1 %v808_v36 }
  0x98   :  { %385 = vmatpush.bf16.msra.mxu1 %v807_v58 }
  0x9c   :  { %386 = vmatpush.bf16.msra.mxu1 %v806_v59 }
 0x108   :  { %v239_v11 = vpop.f32.mrf.mxu0 }
 0x109   :  { %v1077_v12 = vadd.f32 %v901_v10, %v239_v11 }
 0x10b   :  { %v249_v15 = vmax.f32 %v1077_v12, 0.0 }
 0x10d   :  { %v253_v26 = vrot.slane %v249_v15, 7  ;;  %v265_v29 = vrot.slane %v249_v15, 1 }
 0x110   :  { %v241_v16 = vpop.f32.mrf.mxu0  ;;  %v244_v17 = vpop.f32.mrf.mxu2 }
 0x111   :  { %v1080_v18 = vadd.f32 %v901_v10, %v241_v16  ;;  %v1082_v21 = vadd.f32 %v901_v10, %v244_v17 }
 0x113   :  { %v250_v23 = vmax.f32 %v1080_v18, 0.0  ;;  %v251_v24 = vmax.f32 %v1082_v21, 0.0 }
 0x115   :  { %v254_v31 = vrot.slane %v250_v23, 7  ;;  %v266_v32 = vrot.slane %v250_v23, 1  ;;  %v255_v34 = vrot.slane %v251_v24, 7  ;;  %v267_v35 = vrot.slane %v251_v24, 1 }
 0x116   :  { %v861_v37 = vpack.i.bf16 %v250_v23, %v249_v15 }
 0x117   :  { %v270_v38 = vsel %vm126_vm1, %v266_v32, %v267_v35  ;;  %v271_v39 = vsel %vm126_vm1, %v265_v29, %v266_v32  ;;  %v258_v40 = vsel %vm105_vm0, %v254_v31, %v255_v34  ;;  %v259_v41 = vsel %vm105_vm0, %v253_v26, %v254_v31 }
 0x118   :  { %862 = vrot.lane.b32.xlu0 %v861_v37, %s935_s2  ;;  %v246_v42 = vpop.f32.mrf.mxu2  ;;  %v274_v43 = vsel %vm1025_vm3, %v270_v38, 0.0  ;;  %v263_v19 = vsel %vm1037_vm4, %v258_v40, 0.0 }
 0x119   :  { %v1097_v44 = vadd.f32 %v901_v10, %v246_v42  ;;  %v866_v45 = vpack.i.bf16 %v274_v43, %v271_v39 }
 0x11b   :  { %v252_v46 = vmax.f32 %v1097_v44, 0.0  ;;  %867 = vrot.lane.b32.xlu1 %v866_v45, %s936_s16 }
 0x11d   :  { %v256_v47 = vrot.slane %v252_v46, 7  ;;  %v268_v48 = vrot.slane %v252_v46, 1  ;;  %v871_v49 = vpack.i.bf16 %v252_v46, %v251_v24 }
 0x11f   :  { %872 = vrot.lane.b32.xlu2 %v871_v49, %s935_s2  ;;  %v269_v50 = vsel %vm126_vm1, %v267_v35, %v268_v48  ;;  %v272_v27 = vsel %vm126_vm1, %v268_v48, %v265_v29  ;;  %v257_v51 = vsel %vm105_vm0, %v255_v34, %v256_v47  ;;  %v260_v52 = vsel %vm105_vm0, %v256_v47, %v253_v26  ;;  %v812_v34 = vld [vmem:[%s1271_s5] sm:$0xff] }
 0x120   :  { %v276_v53 = vsel %vm1047_vm5, %v272_v27, 0.0  ;;  %v261_v1 = vsel %vm1006_vm2, %v260_v52, 0.0  ;;  %437 = vmatpush.bf16.msrb.mxu2 %v812_v34  ;;  %v902_v35 = vld [vmem:[%s1270_s4] ss:$0 sm:$0xff]  ;;  %v814_v34 = vld [vmem:[%s1269_s3 + $0x30] sm:$0xff]  ;;  %vm95_vm0 = vcmp.ge.s32.totalorder %v55_v28, 3 }
 0x121   :  { %v876_v54 = vpack.i.bf16 %v276_v53, %v269_v50  ;;  %v903_v27 = vld [vmem:[%s1272_s6] ss:$0 sm:$0xff]  ;;  %v819_v53 = vld [vmem:[%s1269_s3 + $0x58] sm:$0xff]  ;;  %v820_v28 = vld [vmem:[%s1271_s5 + $0x10] sm:$0xff]  ;;  %vm681_vm1 = vcmask 257024  }
 0x122   :  { %603 = vmatpush.bf16.msra.mxu3 %v819_v53  ;;  %661 = vmatpush.bf16.msrb.mxu0 %v820_v28 }
 0x123   :  { %877 = vrot.lane.b32.xlu0 %v876_v54, %s936_s16 }
 0x126   :  { %604 = vmatpush.bf16.msra.mxu3 %v818_v55 }
 0x12a   :  { %605 = vmatpush.bf16.msra.mxu3 %v817_v30 }
 0x179   :  { %v873_v6 = vpop.permute.xlu2 %872 }
 0x17a   :  { %v875_v11 = vunpack.i.h.bf16 %v873_v6  ;;  %v874_v15 = vunpack.i.l.bf16 %v873_v6 }
 0x17c   :  { %v311_v24 = vsel %vm223_vm8, %v263_v19, %v874_v15  ;;  %v312_v26 = vsel %vm223_vm8, %v257_v51, %v875_v11 }
 0x18a   :  { %v863_v61 = vpop.permute.xlu0 %862 }
 0x18b   :  { %v865_v62 = vunpack.i.h.bf16 %v863_v61  ;;  %v864_v63 = vunpack.i.l.bf16 %v863_v61 }
 0x18d   :  { %v868_v0 = vpop.permute.xlu1 %867  ;;  %v309_v4 = vsel %vm223_vm8, %v261_v1, %v864_v63  ;;  %v310_v5 = vsel %vm223_vm8, %v259_v41, %v865_v62 }
 0x18e   :  { %v870_v2 = vunpack.i.h.bf16 %v868_v0  ;;  %v869_v3 = vunpack.i.l.bf16 %v868_v0 }
 0x190   :  { %v314_v7 = vsel %vm313_vm9, %v309_v4, %v869_v3  ;;  %v315_v9 = vsel %vm313_vm9, %v310_v5, %v870_v2 }
 0x191   :  { %v318_v10 = vpack.c.bf16 %v315_v9, %v314_v7 }
 0x193   :  { %738 = vmatmul.msk.bf16.vlgmr.msra.gmra.mxu1 %vm372_vm10, %v318_v10 }
 0x195   :  { %v878_v16 = vpop.permute.xlu0 %877 }
 0x196   :  { %v880_v17 = vunpack.i.h.bf16 %v878_v16  ;;  %v879_v23 = vunpack.i.l.bf16 %v878_v16 }
 0x198   :  { %v316_v29 = vsel %vm313_vm9, %v311_v24, %v879_v23  ;;  %v317_v31 = vsel %vm313_vm9, %v312_v26, %v880_v17 }
 0x199   :  { %v319_v32 = vpack.c.bf16 %v317_v31, %v316_v29 }
 0x1a3   :  { %739 = vmatmul.msk.bf16.gmra.mxu1 %vm372_vm10, %v319_v32  ;;  %v816_v32 = vld [vmem:[%s1269_s3 + $0x40] sm:$0xff] }
 0x1a4   :  { %606 = vmatpush.bf16.msra.mxu3 %v816_v32 }
 0x1a8   :  { %607 = vmatpush.bf16.msra.mxu3 %v815_v8 }
 0x1ac   :  { %608 = vmatpush.bf16.msra.mxu3 %v814_v34 }
 0x210   :  { %v388_v33 = vpop.f32.mrf.mxu1 }
 0x211   :  { %v389_v37 = vadd.f32 %v902_v35, %v388_v33 }
 0x213   :  { %v398_v40 = vmax.f32 %v389_v37, 0.0 }
 0x218   :  { %v390_v38 = vpop.f32.mrf.mxu1 }
 0x219   :  { %v391_v39 = vadd.f32 %v902_v35, %v390_v38 }
 0x21b   :  { %v399_v41 = vmax.f32 %v391_v39, 0.0 }
 0x21d   :  { %v402_v42 = vpack.c.bf16 %v399_v41, %v398_v40 }
 0x21f   :  { %748 = vmatmul.msk.bf16.vlgmr.msrb.gmra.mxu2 %vm223_vm8, %v402_v42 }
 0x220   :  { %v393_v43 = vpop.f32.mrf.mxu1 }
 0x221   :  { %v394_v45 = vadd.f32 %v902_v35, %v393_v43 }
 0x223   :  { %v400_v48 = vmax.f32 %v394_v45, 0.0 }
 0x228   :  { %v395_v46 = vpop.f32.mrf.mxu1 }
 0x229   :  { %v396_v47 = vadd.f32 %v902_v35, %v395_v46 }
 0x22b   :  { %v401_v49 = vmax.f32 %v396_v47, 0.0 }
 0x22d   :  { %v403_v50 = vpack.c.bf16 %v401_v49, %v400_v48 }
 0x22f   :  { %749 = vmatmul.msk.bf16.gmra.mxu2 %vm223_vm8, %v403_v50 }
 0x2a2   :  { %v439_v51 = vpop.f32.mrf.mxu2 }
 0x2a3   :  { %v440_v52 = vadd.f32 %v903_v27, %v439_v51 }
 0x2a5   :  { %v1163_v54 = vadd.f32 %v440_v52, %v1077_v12 }
 0x2a7   :  { %v453_v36 = vmax.f32 %v1163_v54, 0.0 }
 0x2a9   :  { %v457_v60 = vrot.slane %v453_v36, 5  ;;  %v478_v5 = vrot.slane %v453_v36, 3 }
 0x2aa   :  { %v441_v56 = vpop.f32.mrf.mxu2 }
 0x2ab   :  { %v442_v57 = vadd.f32 %v903_v27, %v441_v56 }
 0x2ad   :  { %v1170_v58 = vadd.f32 %v442_v57, %v1080_v18 }
 0x2af   :  { %v454_v59 = vmax.f32 %v1170_v58, 0.0 }
 0x2b1   :  { %v458_v12 = vrot.slane %v454_v59, 5  ;;  %v881_v61 = vpack.i.bf16 %v454_v59, %v453_v36  ;;  %v479_v2 = vrot.slane %v454_v59, 3 }
 0x2b2   :  { %v444_v62 = vpop.f32.mrf.mxu2 }
 0x2b3   :  { %v445_v63 = vadd.f32 %v903_v27, %v444_v62  ;;  %882 = vrot.lane.b32.xlu1 %v881_v61, %s935_s2  ;;  %v464_v0 = vsel %vm461_vm11, %v457_v60, %v458_v12  ;;  %v485_v10 = vsel %vm482_vm13, %v478_v5, %v479_v2 }
 0x2b5   :  { %v1178_v1 = vadd.f32 %v445_v63, %v1082_v21 }
 0x2b7   :  { %v455_v18 = vmax.f32 %v1178_v1, 0.0 }
 0x2b9   :  { %v459_v3 = vrot.slane %v455_v18, 5  ;;  %v480_v4 = vrot.slane %v455_v18, 3 }
 0x2ba   :  { %v446_v6 = vpop.f32.mrf.mxu2 }
 0x2bb   :  { %v447_v7 = vadd.f32 %v903_v27, %v446_v6  ;;  %v484_v9 = vsel %vm482_vm13, %v479_v2, %v480_v4  ;;  %v463_v21 = vsel %vm461_vm11, %v458_v12, %v459_v3 }
 0x2bc   :  { %v496_v11 = vsel %vm98_vm12, %v484_v9, 0.0  ;;  %v476_v27 = vsel %vm95_vm0, %v463_v21, 0.0  ;;  %v905_v21 = vld [vmem:[%s1272_s6 + $0x1] ss:$0 sm:$0xff] }
 0x2bd   :  { %v1191_v15 = vadd.f32 %v447_v7, %v1097_v44  ;;  %v886_v14 = vpack.i.bf16 %v496_v11, %v485_v10 }
 0x2bf   :  { %v456_v20 = vmax.f32 %v1191_v15, 0.0  ;;  %887 = vrot.lane.b32.xlu2 %v886_v14, %s936_s16 }
 0x2c1   :  { %v460_v19 = vrot.slane %v456_v20, 5  ;;  %v481_v17 = vrot.slane %v456_v20, 3  ;;  %v891_v23 = vpack.i.bf16 %v456_v20, %v455_v18 }
 0x2c3   :  { %892 = vrot.lane.b32.xlu0 %v891_v23, %s935_s2  ;;  %v483_v44 = vsel %vm482_vm13, %v480_v4, %v481_v17  ;;  %v486_v24 = vsel %vm482_vm13, %v481_v17, %v478_v5  ;;  %v465_v13 = vsel %vm461_vm11, %v460_v19, %v457_v60  ;;  %v462_v26 = vsel %vm461_vm11, %v459_v3, %v460_v19  ;;  %v904_v60 = vld [vmem:[%s1270_s4 + $0x1] ss:$0 sm:$0xff]  ;;  %s937_s4 = smov [#allocation2]  }
 0x2c4   :  { %v498_v29 = vsel %vm100_vm15, %v486_v24, 0.0  ;;  %v474_v31 = vsel %vm1197_vm14, %v465_v13, 0.0  ;;  %s690_s6 = sshll.u32 %s937_s4, 4  ;;  %s691_s6 = int_to_ptr.vmem [resolvable:$true] %s690_s6 }
 0x2c5   :  { %v896_v25 = vpack.i.bf16 %v498_v29, %v483_v44 }
 0x2c7   :  { %897 = vrot.lane.b32.xlu1 %v896_v25, %s936_s16 }
 0x319   :  { %v888_v33 = vpop.permute.xlu2 %887 }
 0x31a   :  { %v890_v39 = vunpack.i.h.bf16 %v888_v33  ;;  %v889_v40 = vunpack.i.l.bf16 %v888_v33 }
 0x325   :  { %v883_v35 = vpop.permute.xlu1 %882 }
 0x326   :  { %v885_v37 = vunpack.i.h.bf16 %v883_v35  ;;  %v884_v38 = vunpack.i.l.bf16 %v883_v35 }
 0x328   :  { %v531_v41 = vsel %vm223_vm8, %v474_v31, %v884_v38  ;;  %v532_v42 = vsel %vm223_vm8, %v464_v0, %v885_v37 }
 0x329   :  { %v535_v43 = vsel %vm313_vm9, %v531_v41, %v889_v40  ;;  %v536_v45 = vsel %vm313_vm9, %v532_v42, %v890_v39 }
 0x32a   :  { %v539_v46 = vpack.c.bf16 %v536_v45, %v535_v43 }
 0x32c   :  { %787 = vmatmul.msk.bf16.vlgmr.msra.gmra.mxu3 %vm372_vm10, %v539_v46 }
 0x335   :  { %v893_v47 = vpop.permute.xlu0 %892 }
 0x336   :  { %v895_v48 = vunpack.i.h.bf16 %v893_v47  ;;  %v894_v49 = vunpack.i.l.bf16 %v893_v47 }
 0x338   :  { %v533_v53 = vsel %vm223_vm8, %v476_v27, %v894_v49  ;;  %v534_v55 = vsel %vm223_vm8, %v462_v26, %v895_v48 }
 0x339   :  { %v898_v50 = vpop.permute.xlu1 %897 }
 0x33a   :  { %v900_v51 = vunpack.i.h.bf16 %v898_v50  ;;  %v899_v52 = vunpack.i.l.bf16 %v898_v50 }
 0x33c   :  { %v537_v56 = vsel %vm313_vm9, %v533_v53, %v899_v52  ;;  %v538_v57 = vsel %vm313_vm9, %v534_v55, %v900_v51 }
 0x33d   :  { %v540_v36 = vpack.c.bf16 %v538_v57, %v537_v56 }
 0x33f   :  { %788 = vmatmul.msk.bf16.gmra.mxu3 %vm372_vm10, %v540_v36 }
 0x3af   :  { %v610_v59 = vpop.f32.mrf.mxu3 }
 0x3b0   :  { %v611_v12 = vadd.f32 %v904_v60, %v610_v59 }
 0x3b2   :  { %v620_v63 = vmax.f32 %v611_v12, 0.0 }
 0x3b7   :  { %v612_v61 = vpop.f32.mrf.mxu3 }
 0x3b8   :  { %v613_v62 = vadd.f32 %v904_v60, %v612_v61 }
 0x3ba   :  { %v621_v0 = vmax.f32 %v613_v62, 0.0 }
 0x3bc   :  { %v624_v18 = vpack.c.bf16 %v621_v0, %v620_v63 }
 0x3be   :  { %802 = vmatmul.msk.bf16.vlgmr.msrb.gmra.mxu0 %vm223_vm8, %v624_v18 }
 0x3c2   :  { %v615_v2 = vpop.f32.mrf.mxu3 }
 0x3c3   :  { %v616_v3 = vadd.f32 %v904_v60, %v615_v2 }
 0x3c5   :  { %v622_v6 = vmax.f32 %v616_v3, 0.0 }
 0x3ca   :  { %v617_v4 = vpop.f32.mrf.mxu3 }
 0x3cb   :  { %v618_v5 = vadd.f32 %v904_v60, %v617_v4 }
 0x3cd   :  { %v623_v7 = vmax.f32 %v618_v5, 0.0 }
 0x3cf   :  { %v625_v9 = vpack.c.bf16 %v623_v7, %v622_v6 }
 0x3d1   :  { %803 = vmatmul.msk.bf16.gmra.mxu0 %vm223_vm8, %v625_v9 }
 0x43b   :  { %v663_v10 = vpop.f32.mrf.mxu0 }
 0x43c   :  { %v664_v11 = vadd.f32 %v905_v21, %v663_v10 }
 0x43e   :  { %v673_v14 = vadd.f32 %v664_v11, %v1163_v54 }
 0x440   :  { %v677_v20 = vpack.c.bf16 %v673_v14, %v673_v14 }
 0x442   :  { %682 = vst.msk [vmem:[#allocation2] sm:$0xf] %vm681_vm1, %v677_v20 }
 0x443   :  { %v665_v16 = vpop.f32.mrf.mxu0 }
 0x444   :  { %v666_v19 = vadd.f32 %v905_v21, %v665_v16 }
 0x446   :  { %v674_v17 = vadd.f32 %v666_v19, %v1170_v58 }
 0x448   :  { %v678_v23 = vpack.c.bf16 %v674_v17, %v674_v17 }
 0x44a   :  { %683 = vst.msk [vmem:[#allocation2 + $0x4] sm:$0xf] %vm681_vm1, %v678_v23 }
 0x44e   :  { %v668_v44 = vpop.f32.mrf.mxu0 }
 0x44f   :  { %v669_v24 = vadd.f32 %v905_v21, %v668_v44 }
 0x451   :  { %v675_v13 = vadd.f32 %v669_v24, %v1178_v1 }
 0x453   :  { %v679_v26 = vpack.c.bf16 %v675_v13, %v675_v13 }
 0x455   :  { %684 = vst.msk [vmem:[#allocation2 + $0x8] sm:$0xf] %vm681_vm1, %v679_v26 }
 0x456   :  { %v670_v29 = vpop.f32.mrf.mxu0 }
 0x457   :  { %v671_v54 = vadd.f32 %v905_v21, %v670_v29 }
 0x459   :  { %v676_v58 = vadd.f32 %v671_v54, %v1191_v15 }
 0x45b   :  { %v680_v31 = vpack.c.bf16 %v676_v58, %v676_v58 }
 0x45d   :  { %685 = vst.msk [vmem:[#allocation2 + $0xc] sm:$0xf] %vm681_vm1, %v680_v31 }
 0x45e   :  { %698 = dma.vmem_to_hbm [thread:$0]  %s691_s6, 256, %s693_s0, [#allocation3], %s936_s16, %s936_s16, %s938_s9  }
 0x45f   :  { %930 = dma.done.wait [#allocation3], 256  }
 0x460   :  { %931 = vsyncadd [#allocation3], 4294967040 }
 0x461   :  { %703 = vsyncpa [#allocation3], 1 }

</bundles_post_ra>
